<compile_context>
chip_gen: v7x
topology: tpu7x:2x2x1
jax: 0.10.0
libtpu: 0.0.40
codegen_flags: <defaults>
</compile_context>

<pallas_src>
import functools

import jax
import jax.numpy as jnp
from jax.experimental import pallas as pl
from jax.experimental.pallas import tpu as pltpu


def _attention_kernel(x_ref, wqkv_ref, bqkv_ref, wproj_ref, bproj_ref,
                      out_ref, *rest,
                      num_heads, q_tile, compute_dtype, return_attn):
    # Block shapes:
    #   x_ref    : (1, N, C)       full sequence for the current batch element
    #   out_ref  : (1, TQ, C)      current query tile
    #   attn_ref : (1, H, TQ, N)   attention probs (only if return_attn)
    # Scratch (persists across grid steps):
    #   k_scratch : (C, N)  compute_dtype  -- K^T cached per batch element
    #   v_scratch : (N, C)  compute_dtype  -- V cached per batch element
    if return_attn:
        attn_ref, k_scratch, v_scratch = rest
    else:
        attn_ref = None
        k_scratch, v_scratch = rest

    qi = pl.program_id(1)
    N = x_ref.shape[1]
    C = x_ref.shape[2]
    hd = C // num_heads
    scale = hd ** (-0.5)

    # ---- K / V projection: once per batch element (first query tile) -------
    @pl.when(qi == 0)
    def _():
        x_full = x_ref[0].astype(compute_dtype)                     # (N, C)
        k = (jnp.dot(x_full, wqkv_ref[:, C:2 * C],
                     preferred_element_type=jnp.float32)
             + bqkv_ref[:, C:2 * C])                                 # (N, C) f32
        v = (jnp.dot(x_full, wqkv_ref[:, 2 * C:3 * C],
                     preferred_element_type=jnp.float32)
             + bqkv_ref[:, 2 * C:3 * C])                             # (N, C) f32
        # Single (N, C) transpose per batch element (instead of H * n_q
        # per-head transposes in the inner loop).
        k_scratch[...] = k.T.astype(compute_dtype)                   # (C, N)
        v_scratch[...] = v.astype(compute_dtype)                     # (N, C)

    # ---- Q projection for this query tile; fold softmax scale into q -------
    q_start = pl.multiple_of(qi * q_tile, q_tile)
    x_q = x_ref[0, pl.ds(q_start, q_tile), :].astype(compute_dtype)  # (TQ, C)
    q = (jnp.dot(x_q, wqkv_ref[:, 0:C], preferred_element_type=jnp.float32)
         + bqkv_ref[:, 0:C]) * scale
    q = q.astype(compute_dtype)                                      # (TQ, C)

    # ---- per-head attention, heads processed in lane-dense groups ----------
    # Pick heads-per-group so the group width (hpg * hd) is a multiple of 128
    # lanes when the head count allows it (e.g. hd=64, H=12 -> pairs of heads,
    # 128-wide group); otherwise fall back to whatever divides H.
    hpg = 1
    while (hpg < num_heads and (hpg * hd) % 128 != 0
           and num_heads % (2 * hpg) == 0):
        hpg *= 2
    gw = hpg * hd

    out_acc = None
    for g in range(num_heads // hpg):
        o_parts = []
        for hh in range(hpg):
            h = g * hpg + hh
            sl = slice(h * hd, (h + 1) * hd)
            qh = q[:, sl]                                            # (TQ, hd)
            khT = k_scratch[sl, :]                                   # (hd, N)
            vh = v_scratch[:, sl]                                    # (N, hd)

            s = jnp.dot(qh, khT, preferred_element_type=jnp.float32)  # (TQ, N)
            s = s - jnp.max(s, axis=-1, keepdims=True)
            p = jnp.exp(s)                                           # f32 softmax
            p = p * pl.reciprocal(jnp.sum(p, axis=-1, keepdims=True),
                                  approx=True)

            if attn_ref is not None:
                attn_ref[0, h] = p.astype(attn_ref.dtype)

            o_parts.append(jnp.dot(p.astype(compute_dtype), vh,
                                   preferred_element_type=jnp.float32))  # (TQ, hd)

        # Concatenate the group's PV results in registers -> lane-dense (TQ, gw)
        o_group = o_parts[0] if hpg == 1 else jnp.concatenate(o_parts, axis=-1)
        # Fold the output projection into the group loop: (TQ, gw) x (gw, C)
        # with gw (typically 128) as the contraction dim.  No (TQ, C) scratch
        # slab, no masked partial stores, no reload.
        partial = jnp.dot(o_group.astype(compute_dtype),
                          wproj_ref[g * gw:(g + 1) * gw, :],
                          preferred_element_type=jnp.float32)        # (TQ, C)
        out_acc = partial if out_acc is None else out_acc + partial

    out_ref[0] = (out_acc + bproj_ref[:, :]).astype(out_ref.dtype)


def attention_forward(x, w_qkv, b_qkv, w_proj, b_proj, num_heads,
                      q_tile=None, compute_dtype=None, return_attn=True):
    """x: (B, N, C); weights in (in, out) layout.

    Returns (out, attn) when return_attn=True (matches the PyTorch module),
    otherwise just `out` (skips the O(B*H*N^2) attention-probs writeback).
    compute_dtype controls the MXU operand / K,V-scratch dtype (default bf16;
    pass jnp.float32 for full precision). Accumulation is always f32.
    """
    B, N, C = x.shape
    assert C % num_heads == 0, "dim must be divisible by num_heads"
    if compute_dtype is None:
        compute_dtype = jnp.bfloat16
    if q_tile is None:
        if N % 256 == 0:
            q_tile = 256
        elif N % 128 == 0:
            q_tile = 128
        else:
            q_tile = N
    assert N % q_tile == 0
    n_q = N // q_tile

    w_qkv_c = w_qkv.astype(compute_dtype)
    w_proj_c = w_proj.astype(compute_dtype)
    b_qkv2 = b_qkv.reshape(1, 3 * C).astype(jnp.float32)
    b_proj2 = b_proj.reshape(1, C).astype(jnp.float32)

    isz_x = x.dtype.itemsize
    isz_c = jnp.dtype(compute_dtype).itemsize
    vmem_needed = (
        2 * N * C * isz_x                                   # x block (double-buffered)
        + (3 * C * C + C * C) * isz_c                       # weights (single-buffered)
        + 4 * C * 4                                         # biases (f32)
        + 2 * q_tile * C * isz_x                            # out block (double-buffered)
        + (2 * num_heads * q_tile * N * isz_x if return_attn else 0)
        + 2 * N * C * isz_c                                 # K^T / V scratch
    )
    # Headroom for in-kernel f32 temporaries (s/p/q/partials) + compiler scratch.
    # Never blindly request 64 MiB (whole per-TC VMEM on v7x); clamp well below
    # the 128 MiB of v5e/v6e.
    vmem_limit = min(100 * 1024 * 1024,
                     max(32 * 1024 * 1024,
                         int(1.25 * vmem_needed) + (8 << 20)))

    kernel = functools.partial(_attention_kernel,
                               num_heads=num_heads, q_tile=q_tile,
                               compute_dtype=compute_dtype,
                               return_attn=return_attn)

    out_shape = [jax.ShapeDtypeStruct((B, N, C), x.dtype)]
    out_specs = [pl.BlockSpec((1, q_tile, C), lambda b, q: (b, q, 0))]
    if return_attn:
        out_shape.append(jax.ShapeDtypeStruct((B, num_heads, N, N), x.dtype))
        out_specs.append(pl.BlockSpec((1, num_heads, q_tile, N),
                                      lambda b, q: (b, 0, q, 0)))

    results = pl.pallas_call(
        kernel,
        out_shape=tuple(out_shape),
        grid_spec=pltpu.PrefetchScalarGridSpec(
            num_scalar_prefetch=0,
            grid=(B, n_q),
            in_specs=[
                # full sequence per batch element (needed for K/V projection);
                # constant across the query-tile axis -> DMA'd once per batch.
                pl.BlockSpec((1, N, C), lambda b, q: (b, 0, 0)),
                # weights / biases: constant blocks -> single-buffered.
                pl.BlockSpec((C, 3 * C), lambda b, q: (0, 0),
                             pipeline_mode=pl.Buffered(1)),
                pl.BlockSpec((1, 3 * C), lambda b, q: (0, 0),
                             pipeline_mode=pl.Buffered(1)),
                pl.BlockSpec((C, C), lambda b, q: (0, 0),
                             pipeline_mode=pl.Buffered(1)),
                pl.BlockSpec((1, C), lambda b, q: (0, 0),
                             pipeline_mode=pl.Buffered(1)),
            ],
            out_specs=out_specs,
            scratch_shapes=[
                pltpu.VMEM((C, N), compute_dtype),   # K^T cache
                pltpu.VMEM((N, C), compute_dtype),   # V cache
            ],
        ),
        compiler_params=pltpu.CompilerParams(
            # query-tile axis carries K/V scratch across iterations -> arbitrary
            dimension_semantics=("parallel", "arbitrary"),
            vmem_limit_bytes=vmem_limit,
        ),
    )(x, w_qkv_c, b_qkv2, w_proj_c, b_proj2)

    if return_attn:
        out, attn = results
        return out, attn
    (out,) = results
    return out


def attention_reference(x, w_qkv, b_qkv, w_proj, b_proj, num_heads):
    """Pure-JAX reference matching the PyTorch forward (mask=None, drop=0)."""
    B, N, C = x.shape
    hd = C // num_heads
    qkv = x @ w_qkv + b_qkv                                    # (B, N, 3C)
    qkv = qkv.reshape(B, N, 3, num_heads, hd).transpose(2, 0, 3, 1, 4)
    q, k, v = qkv[0], qkv[1], qkv[2]                           # (B, H, N, hd)
    attn = jnp.einsum('bhqd,bhkd->bhqk', q, k) * (hd ** -0.5)
    attn = jax.nn.softmax(attn, axis=-1)
    o = jnp.einsum('bhqk,bhkd->bhqd', attn, v)                 # (B, H, N, hd)
    o = o.transpose(0, 2, 1, 3).reshape(B, N, C)
    out = o @ w_proj + b_proj
    return out, attn


if __name__ == "__main__":
    B, N, C = 2, 8, 32
    num_heads = 4

    key = jax.random.PRNGKey(0)
    kx, kw1, kb1, kw2, kb2 = jax.random.split(key, 5)

    x = jax.random.normal(kx, (B, N, C), dtype=jnp.float32)
    # deterministic "init": small random weights, (in, out) layout
    w_qkv = jax.random.normal(kw1, (C, 3 * C), dtype=jnp.float32) * 0.05
    b_qkv = jax.random.normal(kb1, (3 * C,), dtype=jnp.float32) * 0.05
    w_proj = jax.random.normal(kw2, (C, C), dtype=jnp.float32) * 0.05
    b_proj = jax.random.normal(kb2, (C,), dtype=jnp.float32) * 0.05

    ref_out, ref_attn = attention_reference(x, w_qkv, b_qkv, w_proj, b_proj,
                                            num_heads)

    # 1) full-precision path (f32 MXU operands).  Tolerance 2e-3 covers the
    #    hardware approximate reciprocal in the softmax denominator.
    out32, attn32 = attention_forward(x, w_qkv, b_qkv, w_proj, b_proj,
                                      num_heads, compute_dtype=jnp.float32)
    out32 = jax.block_until_ready(out32)
    attn32 = jax.block_until_ready(attn32)
    assert out32.shape == (B, N, C) and attn32.shape == (B, num_heads, N, N)
    assert jnp.allclose(out32, ref_out, atol=2e-3, rtol=2e-3)
    assert jnp.allclose(attn32, ref_attn, atol=2e-3, rtol=2e-3)

    # 2) default performance path (bf16 operands / K,V scratch, f32 accum).
    out_bf, attn_bf = attention_forward(x, w_qkv, b_qkv, w_proj, b_proj,
                                        num_heads)
    out_bf = jax.block_until_ready(out_bf)
    attn_bf = jax.block_until_ready(attn_bf)
    assert jnp.allclose(out_bf, ref_out, atol=3e-2, rtol=3e-2)
    assert jnp.allclose(attn_bf, ref_attn, atol=3e-2, rtol=3e-2)

    # 3) out-only entry point (skips the O(B*H*N^2) attention-probs writeback).
    out_only = attention_forward(x, w_qkv, b_qkv, w_proj, b_proj, num_heads,
                                 compute_dtype=jnp.float32, return_attn=False)
    out_only = jax.block_until_ready(out_only)
    assert jnp.allclose(out_only, ref_out, atol=2e-3, rtol=2e-3)

    print("KERNEL_OK")
</pallas_src>

<mosaic_0001>
module attributes {stable_mosaic.version = 11 : i64} {
  func.func @_attention_kernel(%arg0: i32, %arg1: i32, %arg2: memref<1x8x32xf32, #tpu.memory_space<vmem>>, %arg3: memref<32x96xf32, #tpu.memory_space<vmem>>, %arg4: memref<1x96xf32, #tpu.memory_space<vmem>>, %arg5: memref<32x32xf32, #tpu.memory_space<vmem>>, %arg6: memref<1x32xf32, #tpu.memory_space<vmem>>, %arg7: memref<1x8x32xf32, #tpu.memory_space<vmem>>, %arg8: memref<1x4x8x8xf32, #tpu.memory_space<vmem>>, %arg9: memref<32x8xf32, #tpu.memory_space<vmem>>, %arg10: memref<8x32xf32, #tpu.memory_space<vmem>>) attributes {dimension_semantics = [#tpu.dimension_semantics<parallel>, #tpu.dimension_semantics<arbitrary>], iteration_bounds = array<i64: 2, 1>, scalar_prefetch = 0 : i64, scratch_operands = 2 : i64, tpu.core_type = #tpu.core_type<tc>, window_params = [{transform_indices = @transform_0, window_bounds = array<i64: 1, 8, 32>}, {pipeline_mode = #tpu.pipeline_mode<synchronous>, transform_indices = @transform_1, window_bounds = array<i64: 32, 96>}, {pipeline_mode = #tpu.pipeline_mode<synchronous>, transform_indices = @transform_2, window_bounds = array<i64: 1, 96>}, {pipeline_mode = #tpu.pipeline_mode<synchronous>, transform_indices = @transform_3, window_bounds = array<i64: 32, 32>}, {pipeline_mode = #tpu.pipeline_mode<synchronous>, transform_indices = @transform_4, window_bounds = array<i64: 1, 32>}, {transform_indices = @transform_5, window_bounds = array<i64: 1, 8, 32>}, {transform_indices = @transform_6, window_bounds = array<i64: 1, 4, 8, 8>}]} {
    %c0_i32 = arith.constant 0 : i32
    %0 = arith.cmpi eq, %arg1, %c0_i32 : i32
    %1 = arith.extui %0 : i1 to i32
    %c0_i32_0 = arith.constant 0 : i32
    %2 = arith.cmpi ne, %1, %c0_i32_0 : i32
    scf.if %2 {
      %c0_57 = arith.constant 0 : index
      %c0_58 = arith.constant 0 : index
      %c0_59 = arith.constant 0 : index
      %96 = vector.load %arg2[%c0_57, %c0_58, %c0_59] : memref<1x8x32xf32, #tpu.memory_space<vmem>>, vector<1x8x32xf32>
      %97 = vector.shape_cast %96 : vector<1x8x32xf32> to vector<8x32xf32>
      %c0_60 = arith.constant 0 : index
      %c32 = arith.constant 32 : index
      %98 = vector.load %arg3[%c0_60, %c32] : memref<32x96xf32, #tpu.memory_space<vmem>>, vector<32x32xf32>
      %cst_61 = arith.constant dense<0.000000e+00> : vector<8x32xf32>
      %99 = tpu.matmul %97, %98, %cst_61 {dimension_numbers = #tpu.dot_dimension_numbers<[1], [0], [0], [1], [0, 0, 1, 1], [], []>} : vector<8x32xf32>, vector<32x32xf32>, vector<8x32xf32> -> vector<8x32xf32>
      %c0_62 = arith.constant 0 : index
      %c32_63 = arith.constant 32 : index
      %100 = vector.load %arg4[%c0_62, %c32_63] : memref<1x96xf32, #tpu.memory_space<vmem>>, vector<1x32xf32>
      %101 = vector.broadcast %100 : vector<1x32xf32> to vector<8x32xf32>
      %102 = arith.addf %99, %101 : vector<8x32xf32>
      %c0_64 = arith.constant 0 : index
      %c64 = arith.constant 64 : index
      %103 = vector.load %arg3[%c0_64, %c64] : memref<32x96xf32, #tpu.memory_space<vmem>>, vector<32x32xf32>
      %cst_65 = arith.constant dense<0.000000e+00> : vector<8x32xf32>
      %104 = tpu.matmul %97, %103, %cst_65 {dimension_numbers = #tpu.dot_dimension_numbers<[1], [0], [0], [1], [0, 0, 1, 1], [], []>} : vector<8x32xf32>, vector<32x32xf32>, vector<8x32xf32> -> vector<8x32xf32>
      %c0_66 = arith.constant 0 : index
      %c64_67 = arith.constant 64 : index
      %105 = vector.load %arg4[%c0_66, %c64_67] : memref<1x96xf32, #tpu.memory_space<vmem>>, vector<1x32xf32>
      %106 = vector.broadcast %105 : vector<1x32xf32> to vector<8x32xf32>
      %107 = arith.addf %104, %106 : vector<8x32xf32>
      %108 = tpu.transpose %102, [1, 0] : vector<8x32xf32> -> vector<32x8xf32>
      %c0_68 = arith.constant 0 : index
      %c0_69 = arith.constant 0 : index
      %109 = vector.load %arg9[%c0_68, %c0_69] : memref<32x8xf32, #tpu.memory_space<vmem>>, vector<32x8xf32>
      tpu.vector_store %arg9[%c0_68, %c0_69], %108 {strides = array<i32>} : memref<32x8xf32, #tpu.memory_space<vmem>>, vector<32x8xf32>,
      %c0_70 = arith.constant 0 : index
      %c0_71 = arith.constant 0 : index
      %110 = vector.load %arg10[%c0_70, %c0_71] : memref<8x32xf32, #tpu.memory_space<vmem>>, vector<8x32xf32>
      tpu.vector_store %arg10[%c0_70, %c0_71], %107 {strides = array<i32>} : memref<8x32xf32, #tpu.memory_space<vmem>>, vector<8x32xf32>,
    } else {
    }
    %c8_i32 = arith.constant 8 : i32
    %3 = arith.muli %arg1, %c8_i32 : i32
    %4 = tpu.assume_multiple %3, 8 : i32
    %c0 = arith.constant 0 : index
    %5 = arith.index_cast %4 : i32 to index
    %c0_1 = arith.constant 0 : index
    %6 = vector.load %arg2[%c0, %5, %c0_1] : memref<1x8x32xf32, #tpu.memory_space<vmem>>, vector<1x8x32xf32>
    %7 = vector.shape_cast %6 : vector<1x8x32xf32> to vector<8x32xf32>
    %c0_2 = arith.constant 0 : index
    %c0_3 = arith.constant 0 : index
    %8 = vector.load %arg3[%c0_2, %c0_3] : memref<32x96xf32, #tpu.memory_space<vmem>>, vector<32x32xf32>
    %cst = arith.constant dense<0.000000e+00> : vector<8x32xf32>
    %9 = tpu.matmul %7, %8, %cst {dimension_numbers = #tpu.dot_dimension_numbers<[1], [0], [0], [1], [0, 0, 1, 1], [], []>} : vector<8x32xf32>, vector<32x32xf32>, vector<8x32xf32> -> vector<8x32xf32>
    %c0_4 = arith.constant 0 : index
    %c0_5 = arith.constant 0 : index
    %10 = vector.load %arg4[%c0_4, %c0_5] : memref<1x96xf32, #tpu.memory_space<vmem>>, vector<1x32xf32>
    %11 = vector.broadcast %10 : vector<1x32xf32> to vector<8x32xf32>
    %12 = arith.addf %9, %11 : vector<8x32xf32>
    %cst_6 = arith.constant 0.353553385 : f32
    %13 = vector.broadcast %cst_6 : f32 to vector<8x32xf32>
    %14 = arith.mulf %12, %13 : vector<8x32xf32>
    %15 = vector.extract_strided_slice %14 {offsets = [0, 0], sizes = [8, 8], strides = [1, 1]} : vector<8x32xf32> to vector<8x8xf32>
    %c0_7 = arith.constant 0 : index
    %c0_8 = arith.constant 0 : index
    %16 = vector.load %arg9[%c0_7, %c0_8] : memref<32x8xf32, #tpu.memory_space<vmem>>, vector<8x8xf32>
    %c0_9 = arith.constant 0 : index
    %c0_10 = arith.constant 0 : index
    %17 = vector.load %arg10[%c0_9, %c0_10] : memref<8x32xf32, #tpu.memory_space<vmem>>, vector<8x8xf32>
    %cst_11 = arith.constant dense<0.000000e+00> : vector<8x8xf32>
    %18 = tpu.matmul %15, %16, %cst_11 {dimension_numbers = #tpu.dot_dimension_numbers<[1], [0], [0], [1], [0, 0, 1, 1], [], []>} : vector<8x8xf32>, vector<8x8xf32>, vector<8x8xf32> -> vector<8x8xf32>
    %cst_12 = arith.constant dense<0xFF800000> : vector<8xf32>
    %19 = vector.multi_reduction <maximumf>, %18, %cst_12 [1] : vector<8x8xf32> to vector<8xf32>
    %20 = vector.shape_cast %19 : vector<8xf32> to vector<8x1xf32>
    %21 = vector.broadcast %20 : vector<8x1xf32> to vector<8x8xf32>
    %22 = arith.subf %18, %21 : vector<8x8xf32>
    %23 = math.exp %22 : vector<8x8xf32>
    %cst_13 = arith.constant dense<0.000000e+00> : vector<8xf32>
    %24 = vector.multi_reduction <add>, %23, %cst_13 [1] : vector<8x8xf32> to vector<8xf32>
    %25 = vector.shape_cast %24 : vector<8xf32> to vector<8x1xf32>
    %26 = tpu.reciprocal %25 {approx = true} : vector<8x1xf32> -> vector<8x1xf32>
    %27 = vector.broadcast %26 : vector<8x1xf32> to vector<8x8xf32>
    %28 = arith.mulf %23, %27 : vector<8x8xf32>
    %c0_14 = arith.constant 0 : index
    %c0_15 = arith.constant 0 : index
    %c0_16 = arith.constant 0 : index
    %c0_17 = arith.constant 0 : index
    %29 = vector.load %arg8[%c0_14, %c0_15, %c0_16, %c0_17] : memref<1x4x8x8xf32, #tpu.memory_space<vmem>>, vector<1x1x8x8xf32>
    %30 = vector.shape_cast %29 : vector<1x1x8x8xf32> to vector<8x8xf32>
    %31 = vector.shape_cast %28 : vector<8x8xf32> to vector<1x1x8x8xf32>
    tpu.vector_store %arg8[%c0_14, %c0_15, %c0_16, %c0_17], %31 {strides = array<i32>} : memref<1x4x8x8xf32, #tpu.memory_space<vmem>>, vector<1x1x8x8xf32>,
    %cst_18 = arith.constant dense<0.000000e+00> : vector<8x8xf32>
    %32 = tpu.matmul %28, %17, %cst_18 {dimension_numbers = #tpu.dot_dimension_numbers<[1], [0], [0], [1], [0, 0, 1, 1], [], []>} : vector<8x8xf32>, vector<8x8xf32>, vector<8x8xf32> -> vector<8x8xf32>
    %33 = vector.extract_strided_slice %14 {offsets = [0, 8], sizes = [8, 8], strides = [1, 1]} : vector<8x32xf32> to vector<8x8xf32>
    %c8 = arith.constant 8 : index
    %c0_19 = arith.constant 0 : index
    %34 = vector.load %arg9[%c8, %c0_19] : memref<32x8xf32, #tpu.memory_space<vmem>>, vector<8x8xf32>
    %c0_20 = arith.constant 0 : index
    %c8_21 = arith.constant 8 : index
    %35 = vector.load %arg10[%c0_20, %c8_21] : memref<8x32xf32, #tpu.memory_space<vmem>>, vector<8x8xf32>
    %cst_22 = arith.constant dense<0.000000e+00> : vector<8x8xf32>
    %36 = tpu.matmul %33, %34, %cst_22 {dimension_numbers = #tpu.dot_dimension_numbers<[1], [0], [0], [1], [0, 0, 1, 1], [], []>} : vector<8x8xf32>, vector<8x8xf32>, vector<8x8xf32> -> vector<8x8xf32>
    %cst_23 = arith.constant dense<0xFF800000> : vector<8xf32>
    %37 = vector.multi_reduction <maximumf>, %36, %cst_23 [1] : vector<8x8xf32> to vector<8xf32>
    %38 = vector.shape_cast %37 : vector<8xf32> to vector<8x1xf32>
    %39 = vector.broadcast %38 : vector<8x1xf32> to vector<8x8xf32>
    %40 = arith.subf %36, %39 : vector<8x8xf32>
    %41 = math.exp %40 : vector<8x8xf32>
    %cst_24 = arith.constant dense<0.000000e+00> : vector<8xf32>
    %42 = vector.multi_reduction <add>, %41, %cst_24 [1] : vector<8x8xf32> to vector<8xf32>
    %43 = vector.shape_cast %42 : vector<8xf32> to vector<8x1xf32>
    %44 = tpu.reciprocal %43 {approx = true} : vector<8x1xf32> -> vector<8x1xf32>
    %45 = vector.broadcast %44 : vector<8x1xf32> to vector<8x8xf32>
    %46 = arith.mulf %41, %45 : vector<8x8xf32>
    %c0_25 = arith.constant 0 : index
    %c1 = arith.constant 1 : index
    %c0_26 = arith.constant 0 : index
    %c0_27 = arith.constant 0 : index
    %47 = vector.load %arg8[%c0_25, %c1, %c0_26, %c0_27] : memref<1x4x8x8xf32, #tpu.memory_space<vmem>>, vector<1x1x8x8xf32>
    %48 = vector.shape_cast %47 : vector<1x1x8x8xf32> to vector<8x8xf32>
    %49 = vector.shape_cast %46 : vector<8x8xf32> to vector<1x1x8x8xf32>
    tpu.vector_store %arg8[%c0_25, %c1, %c0_26, %c0_27], %49 {strides = array<i32>} : memref<1x4x8x8xf32, #tpu.memory_space<vmem>>, vector<1x1x8x8xf32>,
    %cst_28 = arith.constant dense<0.000000e+00> : vector<8x8xf32>
    %50 = tpu.matmul %46, %35, %cst_28 {dimension_numbers = #tpu.dot_dimension_numbers<[1], [0], [0], [1], [0, 0, 1, 1], [], []>} : vector<8x8xf32>, vector<8x8xf32>, vector<8x8xf32> -> vector<8x8xf32>
    %51 = vector.extract_strided_slice %14 {offsets = [0, 16], sizes = [8, 8], strides = [1, 1]} : vector<8x32xf32> to vector<8x8xf32>
    %c16 = arith.constant 16 : index
    %c0_29 = arith.constant 0 : index
    %52 = vector.load %arg9[%c16, %c0_29] : memref<32x8xf32, #tpu.memory_space<vmem>>, vector<8x8xf32>
    %c0_30 = arith.constant 0 : index
    %c16_31 = arith.constant 16 : index
    %53 = vector.load %arg10[%c0_30, %c16_31] : memref<8x32xf32, #tpu.memory_space<vmem>>, vector<8x8xf32>
    %cst_32 = arith.constant dense<0.000000e+00> : vector<8x8xf32>
    %54 = tpu.matmul %51, %52, %cst_32 {dimension_numbers = #tpu.dot_dimension_numbers<[1], [0], [0], [1], [0, 0, 1, 1], [], []>} : vector<8x8xf32>, vector<8x8xf32>, vector<8x8xf32> -> vector<8x8xf32>
    %cst_33 = arith.constant dense<0xFF800000> : vector<8xf32>
    %55 = vector.multi_reduction <maximumf>, %54, %cst_33 [1] : vector<8x8xf32> to vector<8xf32>
    %56 = vector.shape_cast %55 : vector<8xf32> to vector<8x1xf32>
    %57 = vector.broadcast %56 : vector<8x1xf32> to vector<8x8xf32>
    %58 = arith.subf %54, %57 : vector<8x8xf32>
    %59 = math.exp %58 : vector<8x8xf32>
    %cst_34 = arith.constant dense<0.000000e+00> : vector<8xf32>
    %60 = vector.multi_reduction <add>, %59, %cst_34 [1] : vector<8x8xf32> to vector<8xf32>
    %61 = vector.shape_cast %60 : vector<8xf32> to vector<8x1xf32>
    %62 = tpu.reciprocal %61 {approx = true} : vector<8x1xf32> -> vector<8x1xf32>
    %63 = vector.broadcast %62 : vector<8x1xf32> to vector<8x8xf32>
    %64 = arith.mulf %59, %63 : vector<8x8xf32>
    %c0_35 = arith.constant 0 : index
    %c2 = arith.constant 2 : index
    %c0_36 = arith.constant 0 : index
    %c0_37 = arith.constant 0 : index
    %65 = vector.load %arg8[%c0_35, %c2, %c0_36, %c0_37] : memref<1x4x8x8xf32, #tpu.memory_space<vmem>>, vector<1x1x8x8xf32>
    %66 = vector.shape_cast %65 : vector<1x1x8x8xf32> to vector<8x8xf32>
    %67 = vector.shape_cast %64 : vector<8x8xf32> to vector<1x1x8x8xf32>
    tpu.vector_store %arg8[%c0_35, %c2, %c0_36, %c0_37], %67 {strides = array<i32>} : memref<1x4x8x8xf32, #tpu.memory_space<vmem>>, vector<1x1x8x8xf32>,
    %cst_38 = arith.constant dense<0.000000e+00> : vector<8x8xf32>
    %68 = tpu.matmul %64, %53, %cst_38 {dimension_numbers = #tpu.dot_dimension_numbers<[1], [0], [0], [1], [0, 0, 1, 1], [], []>} : vector<8x8xf32>, vector<8x8xf32>, vector<8x8xf32> -> vector<8x8xf32>
    %69 = vector.extract_strided_slice %14 {offsets = [0, 24], sizes = [8, 8], strides = [1, 1]} : vector<8x32xf32> to vector<8x8xf32>
    %c24 = arith.constant 24 : index
    %c0_39 = arith.constant 0 : index
    %70 = vector.load %arg9[%c24, %c0_39] : memref<32x8xf32, #tpu.memory_space<vmem>>, vector<8x8xf32>
    %c0_40 = arith.constant 0 : index
    %c24_41 = arith.constant 24 : index
    %71 = vector.load %arg10[%c0_40, %c24_41] : memref<8x32xf32, #tpu.memory_space<vmem>>, vector<8x8xf32>
    %cst_42 = arith.constant dense<0.000000e+00> : vector<8x8xf32>
    %72 = tpu.matmul %69, %70, %cst_42 {dimension_numbers = #tpu.dot_dimension_numbers<[1], [0], [0], [1], [0, 0, 1, 1], [], []>} : vector<8x8xf32>, vector<8x8xf32>, vector<8x8xf32> -> vector<8x8xf32>
    %cst_43 = arith.constant dense<0xFF800000> : vector<8xf32>
    %73 = vector.multi_reduction <maximumf>, %72, %cst_43 [1] : vector<8x8xf32> to vector<8xf32>
    %74 = vector.shape_cast %73 : vector<8xf32> to vector<8x1xf32>
    %75 = vector.broadcast %74 : vector<8x1xf32> to vector<8x8xf32>
    %76 = arith.subf %72, %75 : vector<8x8xf32>
    %77 = math.exp %76 : vector<8x8xf32>
    %cst_44 = arith.constant dense<0.000000e+00> : vector<8xf32>
    %78 = vector.multi_reduction <add>, %77, %cst_44 [1] : vector<8x8xf32> to vector<8xf32>
    %79 = vector.shape_cast %78 : vector<8xf32> to vector<8x1xf32>
    %80 = tpu.reciprocal %79 {approx = true} : vector<8x1xf32> -> vector<8x1xf32>
    %81 = vector.broadcast %80 : vector<8x1xf32> to vector<8x8xf32>
    %82 = arith.mulf %77, %81 : vector<8x8xf32>
    %c0_45 = arith.constant 0 : index
    %c3 = arith.constant 3 : index
    %c0_46 = arith.constant 0 : index
    %c0_47 = arith.constant 0 : index
    %83 = vector.load %arg8[%c0_45, %c3, %c0_46, %c0_47] : memref<1x4x8x8xf32, #tpu.memory_space<vmem>>, vector<1x1x8x8xf32>
    %84 = vector.shape_cast %83 : vector<1x1x8x8xf32> to vector<8x8xf32>
    %85 = vector.shape_cast %82 : vector<8x8xf32> to vector<1x1x8x8xf32>
    tpu.vector_store %arg8[%c0_45, %c3, %c0_46, %c0_47], %85 {strides = array<i32>} : memref<1x4x8x8xf32, #tpu.memory_space<vmem>>, vector<1x1x8x8xf32>,
    %cst_48 = arith.constant dense<0.000000e+00> : vector<8x8xf32>
    %86 = tpu.matmul %82, %71, %cst_48 {dimension_numbers = #tpu.dot_dimension_numbers<[1], [0], [0], [1], [0, 0, 1, 1], [], []>} : vector<8x8xf32>, vector<8x8xf32>, vector<8x8xf32> -> vector<8x8xf32>
    %87 = tpu.concatenate %32, %50, %68, %86 in 1 : vector<8x8xf32>, vector<8x8xf32>, vector<8x8xf32>, vector<8x8xf32> -> vector<8x32xf32>
    %c0_49 = arith.constant 0 : index
    %c0_50 = arith.constant 0 : index
    %88 = vector.load %arg5[%c0_49, %c0_50] : memref<32x32xf32, #tpu.memory_space<vmem>>, vector<32x32xf32>
    %cst_51 = arith.constant dense<0.000000e+00> : vector<8x32xf32>
    %89 = tpu.matmul %87, %88, %cst_51 {dimension_numbers = #tpu.dot_dimension_numbers<[1], [0], [0], [1], [0, 0, 1, 1], [], []>} : vector<8x32xf32>, vector<32x32xf32>, vector<8x32xf32> -> vector<8x32xf32>
    %c0_52 = arith.constant 0 : index
    %c0_53 = arith.constant 0 : index
    %90 = vector.load %arg6[%c0_52, %c0_53] : memref<1x32xf32, #tpu.memory_space<vmem>>, vector<1x32xf32>
    %91 = vector.broadcast %90 : vector<1x32xf32> to vector<8x32xf32>
    %92 = arith.addf %89, %91 : vector<8x32xf32>
    %c0_54 = arith.constant 0 : index
    %c0_55 = arith.constant 0 : index
    %c0_56 = arith.constant 0 : index
    %93 = vector.load %arg7[%c0_54, %c0_55, %c0_56] : memref<1x8x32xf32, #tpu.memory_space<vmem>>, vector<1x8x32xf32>
    %94 = vector.shape_cast %93 : vector<1x8x32xf32> to vector<8x32xf32>
    %95 = vector.shape_cast %92 : vector<8x32xf32> to vector<1x8x32xf32>
    tpu.vector_store %arg7[%c0_54, %c0_55, %c0_56], %95 {strides = array<i32>} : memref<1x8x32xf32, #tpu.memory_space<vmem>>, vector<1x8x32xf32>,
    return
  }
  func.func @transform_0(%arg0: i32, %arg1: i32) -> (i32, i32, i32) {
    %c0_i32 = arith.constant 0 : i32
    %c0_i32_0 = arith.constant 0 : i32
    %c0_i32_1 = arith.constant 0 : i32
    return %arg0, %c0_i32, %c0_i32_0 : i32, i32, i32
  }
  func.func @transform_1(%arg0: i32, %arg1: i32) -> (i32, i32) {
    %c0_i32 = arith.constant 0 : i32
    %c0_i32_0 = arith.constant 0 : i32
    %c0_i32_1 = arith.constant 0 : i32
    return %c0_i32, %c0_i32_0 : i32, i32
  }
  func.func @transform_2(%arg0: i32, %arg1: i32) -> (i32, i32) {
    %c0_i32 = arith.constant 0 : i32
    %c0_i32_0 = arith.constant 0 : i32
    %c0_i32_1 = arith.constant 0 : i32
    return %c0_i32, %c0_i32_0 : i32, i32
  }
  func.func @transform_3(%arg0: i32, %arg1: i32) -> (i32, i32) {
    %c0_i32 = arith.constant 0 : i32
    %c0_i32_0 = arith.constant 0 : i32
    %c0_i32_1 = arith.constant 0 : i32
    return %c0_i32, %c0_i32_0 : i32, i32
  }
  func.func @transform_4(%arg0: i32, %arg1: i32) -> (i32, i32) {
    %c0_i32 = arith.constant 0 : i32
    %c0_i32_0 = arith.constant 0 : i32
    %c0_i32_1 = arith.constant 0 : i32
    return %c0_i32, %c0_i32_0 : i32, i32
  }
  func.func @transform_5(%arg0: i32, %arg1: i32) -> (i32, i32, i32) {
    %c0_i32 = arith.constant 0 : i32
    %c0_i32_0 = arith.constant 0 : i32
    return %arg0, %arg1, %c0_i32 : i32, i32, i32
  }
  func.func @transform_6(%arg0: i32, %arg1: i32) -> (i32, i32, i32, i32) {
    %c0_i32 = arith.constant 0 : i32
    %c0_i32_0 = arith.constant 0 : i32
    %c0_i32_1 = arith.constant 0 : i32
    return %arg0, %c0_i32, %arg1, %c0_i32_0 : i32, i32, i32, i32
  }
}

</mosaic_0001>

<bundles_post_ra>
// kernel: tpu_custom_call.1
= control target key start
LH: loop header
LB: loop body
LE: loop exit
PB: predicated region body
PF: predicated region fallthrough
CT: control target
= control target key end

     0   :  { %12 = vsyncpa [#allocation5], 0  ;;  %s2550_s0 = inlined_call_operand.hbm [shape: f32[2,8,32], index: 0, kind: input, shape index: {}]   ;;  %s2551_s1 = inlined_call_operand.hbm [shape: f32[32,96], index: 1, kind: input, shape index: {}]   ;;  %s2552_s2 = inlined_call_operand.vmem [shape: f32[1,96], index: 2, kind: input, shape index: {}]   ;;  %s2553_s3 = inlined_call_operand.hbm [shape: f32[32,32], index: 3, kind: input, shape index: {}]   ;;  %s2554_s4 = inlined_call_operand.vmem [shape: f32[1,32], index: 4, kind: input, shape index: {}]   ;;  %s2555_s5 = inlined_call_operand.hbm [shape: f32[2,8,32], index: 5, kind: output, shape index: {0}]   ;;  %s2556_s6 = inlined_call_operand.hbm [shape: f32[2,4,8,8], index: 6, kind: output, shape index: {1}]  }
   0x1   :  { %14 = vsyncpa [#allocation5 + $0x1], 0 }
   0x2   :  { %15 = vsyncpa [#allocation8], 0 }
   0x3   :  { %16 = vsyncpa [#allocation6], 0 }
   0x4   :  { %18 = vsyncpa [#allocation6 + $0x1], 0 }
   0x5   :  { %19 = vsyncpa [#allocation12], 0 }
   0x6   :  { %21 = vsyncpa [#allocation12 + $0x1], 0  ;;  %s2157_s21 = smov 0   ;;  %s2159_s22 = smov 0  }
   0x7   :  { %s2161_s23 = smov 0   ;;  %s2163_s24 = smov 0  }
   0x8   :  { %s2165_s25 = smov 0   ;;  %s2167_s26 = smov 0  }
   0x9 LB: > { %s1575_s27 = sadd.s32 4294967295, %s2101_s26   ;;  %s1576_s28 = sadd.s32 4294967294, %s2101_s26   ;;  %s2101_s26 = sphi %s2167_s26, %s27_s26   ;;  %s2097_s25 = sphi %s2165_s25, %s2581_s25   ;;  %s2093_s24 = sphi %s2163_s24, %s2580_s24   ;;  %s2089_s23 = sphi %s2161_s23, %s2579_s23   ;;  %s2085_s22 = sphi %s2159_s22, %s2578_s22   ;;  %s2081_s21 = sphi %s2157_s21, %s2577_s21  }
   0xa   : > { %p59_p0 = scmp.ne.s32.totalorder %s2085_s22, %s2081_s21  ;;  %p2191_p1 = scmp.eq.s32.totalorder %s1575_s27, 0 }
   0xb   : > { %p2195_p2 = scmp.eq.s32.totalorder %s1575_s27, 1  ;;  %p175_p3 = scmp.eq.s32.totalorder %s1576_s28, 1 }
   0xc   : > { %s2562_s29 = scalar_select %p2191_p1, 1, 0 }
   0xd   : > { %p2201_p4 = por %p2191_p1, %p59_p0  ;;  %p1577_p5 = scmp.ge.s32.totalorder %s2101_s26, 1 }
   0xe   : > { %p2206_p6 = por %p175_p3, %p59_p0  ;;  %p210_p7 = scmp.lt.s32.totalorder %s2101_s26, 3 }
   0xf   : > { %s2564_s7 = scalar_select %p2201_p4, 1, 0 }
  0x10   : > { %s2565_s8 = scalar_select %p2206_p6, 1, 0 }
  0x11   : > { %p2211_p8 = pnand %p1577_p5, %p210_p7  ;;  %s2103_s10 = smov [#allocation7]  }
  0x12   : > { %2566 = sst [smem:[#allocation17_spill]] %s2565_s8  ;;  %s222_s11 = sshll.u32 %s2103_s10, 4  ;;  %s2215_s11 = int_to_ptr.vmem [resolvable:$true] %s222_s11 }
  0x13   : > { %p1773_p9 = pneg %p2211_p8  ;;  %s2104_s13 = smov [#allocation9]  }
  0x14   : > { %s238_s14 = sshll.u32 %s2104_s13, 4  ;;  %s1897_s17 = scalar_lea.hbm %s2551_s1, 512  ;;  %s2226_s14 = int_to_ptr.vmem [resolvable:$true] %s238_s14 }
  0x15   : > { %p2222_p11 = pnand %p1773_p9, %p2191_p1  ;;  %p1898_p12 = scmp.ne.s32.totalorder %s2551_s1, %s1897_s17 }
  0x16   : > { %p1904_p5 = scmp.lt.u32.totalorder %s1897_s17, %s2551_s1 }
  0x17   : > { %p1899_p13 = pneg %p2222_p11 }
  0x19   : > { %p1900_p0 = pnand %p1899_p13, %p1898_p12 }
  0x1b   : > { %p1901_p3 = pneg %p1900_p0 }
  0x1d   : > { %p1906_p7 = pnand %p1904_p5, %p1901_p3 }
  0x1f   : > { %1909 = shalt.err (!%p1906_p7)
}
  0x20   : > { %s1910_s28 = scalar_lea.vmem %s2215_s11, 512  ;;  %p1918_p1 = scmp.lt.s32.totalorder %s2215_s11, %s2215_s11 }
  0x21   : > { %p1911_p9 = scmp.ne.s32.totalorder %s2215_s11, %s1910_s28  ;;  %p1919_p12 = scmp.lt.s32.totalorder %s1910_s28, %s1910_s28 }
  0x23   : > { %p1913_p10 = pnand %p1911_p9, %p1899_p13  ;;  %p1920_p0 = por %p1919_p12, %p1918_p1 }
  0x25   : > { %p1914_p6 = pneg %p1913_p10 }
  0x27   : > { %p1921_p4 = pnand %p1920_p0, %p1914_p6 }
  0x29   : > { %1924 = shalt.err (!%p1921_p4)
}
  0x2a   : > { %s2105_s10 = smov 128   ;;  %s2106_s13 = smov 8  }
  0x2b   : > { %1776 = dma.hbm_to_vmem [thread:$0]  (!%p2222_p11), %s2551_s1, 512, %s2215_s11, [#allocation8], %s2105_s10, %s2105_s10, %s2106_s13  }
  0x2c   : > { %s1925_s19 = scalar_lea.hbm %s2553_s3, 512 }
  0x2d   : > { %p1926_p1 = scmp.ne.s32.totalorder %s2553_s3, %s1925_s19  ;;  %p1932_p10 = scmp.lt.u32.totalorder %s1925_s19, %s2553_s3 }
  0x2f   : > { %p1928_p4 = pnand %p1926_p1, %p1899_p13 }
  0x31   : > { %p1929_p6 = pneg %p1928_p4 }
  0x33   : > { %p1934_p3 = pnand %p1932_p10, %p1929_p6 }
  0x35   : > { %1937 = shalt.err (!%p1934_p3)
}
  0x36   : > { %s1938_s11 = scalar_lea.vmem %s2226_s14, 512  ;;  %p1946_p12 = scmp.lt.s32.totalorder %s2226_s14, %s2226_s14 }
  0x37   : > { %p1939_p5 = scmp.ne.s32.totalorder %s2226_s14, %s1938_s11  ;;  %p1947_p0 = scmp.lt.s32.totalorder %s1938_s11, %s1938_s11 }
  0x39   : > { %p1941_p7 = pnand %p1939_p5, %p1899_p13  ;;  %p1948_p1 = por %p1947_p0, %p1946_p12 }
  0x3b   : > { %p1942_p9 = pneg %p1941_p7 }
  0x3d   : > { %p1949_p4 = pnand %p1948_p1, %p1942_p9 }
  0x3f   : > { %1952 = shalt.err (!%p1949_p4)
}
  0x40   : > { %1779 = dma.hbm_to_vmem [thread:$0]  (!%p2222_p11), %s2553_s3, 512, %s2226_s14, [#allocation8], %s2105_s10, %s2105_s10, %s2106_s13  }
  0x41   : > { %s39_s16 = sadd.s32 1, %s2097_s25  ;;  %s46_s17 = sadd.s32 1, %s2089_s23 }
  0x42   : > { %p41_p13 = scmp.ge.s32.totalorder %s39_s16, 2  ;;  %p53_p6 = scmp.ne.s32.totalorder %s2089_s23, %s2085_s22 }
  0x43   : > { %p54_p10 = scmp.eq.s32.totalorder %s2101_s26, 0  ;;  %p1793_p3 = scmp.lt.s32.totalorder %s2101_s26, 2 }
  0x44   : > { %s2583_s16 = smov (%p41_p13, %s39_s16), 0  ;;  %p2290_p7 = por %p2195_p2, %p53_p6 }
  0x45   : > { %p55_p5 = por %p54_p10, %p53_p6  ;;  %s43_s18 = ssub.s32 %s2097_s25, %s2583_s16 }
  0x46   : > { %s2569_s12 = scalar_select %p2290_p7, 1, 0 }
  0x47   : > { %s255_s19 = sand.u32 1, %s2089_s23   ;;  %p44_p9 = scmp.eq.s32.totalorder %s43_s18, 0 }
  0x48   : > { %s1581_s14 = sshll.u32 %s255_s19, 3  ;;  %s1582_s10 = sshll.u32 %s2097_s25, 7 }
  0x49   : > { %s2299_s13 = scalar_select %p44_p9, %s2089_s23, %s46_s17  }
  0x4a   : > { %s2304_s28 = scalar_lea.hbm %s2550_s0, %s1582_s10  ;;  %s259_s30 = scalar_lea.vmem [#allocation4], %s1581_s14 }
  0x4b   : > { %s266_s11 = sshll.u32 %s259_s30, 4  ;;  %p2308_p2 = pnand %p1793_p3, %p55_p5  ;;  %s2312_s11 = int_to_ptr.vmem [resolvable:$true] %s266_s11 }
  0x4c   : > { %s256_s15 = scalar_lea.sflag [#allocation5], %s255_s19  ;;  %s1953_s17 = scalar_lea.hbm %s2304_s28, 128 }
  0x4d   : > { %p1954_p11 = scmp.ne.s32.totalorder %s2304_s28, %s1953_s17  ;;  %p1955_p12 = pneg %p2308_p2 }
  0x4e   : > { %s1958_s10 = scalar_lea.hbm %s2550_s0, 256  ;;  %p1959_p4 = scmp.lt.u32.totalorder %s2304_s28, %s2550_s0 }
  0x4f   : > { %p1956_p0 = pnand %p1955_p12, %p1954_p11  ;;  %p1960_p13 = scmp.lt.u32.totalorder %s1958_s10, %s1953_s17 }
  0x50   : > { %p1962_p10 = scmp.lt.u32.totalorder %s1953_s17, %s2304_s28 }
  0x51   : > { %p1957_p1 = pneg %p1956_p0  ;;  %p1961_p6 = por %p1960_p13, %p1959_p4 }
  0x53   : > { %p1963_p3 = por %p1962_p10, %p1961_p6 }
  0x55   : > { %p1964_p5 = pnand %p1963_p3, %p1957_p1 }
  0x57   : > { %1967 = shalt.err (!%p1964_p5)
}
  0x58   : > { %s1968_s19 = scalar_lea.vmem %s2312_s11, 128  ;;  %s2107_s30 = smov [#allocation4]  }
  0x59   : > { %p1969_p9 = scmp.ne.s32.totalorder %s2312_s11, %s1968_s19  ;;  %s1973_s18 = sshll.u32 %s2107_s30, 4  ;;  %s1974_s18 = int_to_ptr.vmem [resolvable:$false] %s1973_s18 }
  0x5a   : > { %s1975_s14 = scalar_lea.vmem %s1974_s18, 256  ;;  %p1976_p7 = scmp.lt.s32.totalorder %s2312_s11, %s1974_s18 }
  0x5b   : > { %p1971_p11 = pnand %p1969_p9, %p1955_p12  ;;  %p1977_p4 = scmp.lt.s32.totalorder %s1975_s14, %s1968_s19 }
  0x5d   : > { %p1972_p0 = pneg %p1971_p11  ;;  %p1978_p13 = por %p1977_p4, %p1976_p7 }
  0x5f   : > { %p1979_p6 = pnand %p1978_p13, %p1972_p0 }
  0x61   : > { %1982 = shalt.err (!%p1979_p6)
}
  0x62   : > { %1783 = dma.hbm_to_vmem [thread:$0]  (!%p2308_p2), %s2304_s28, 128, %s2312_s11, %s256_s15  }
  0x63   : > { %275 = sbr.rel (%p2211_p8) target bundleno = 2222 (0x8ae), region = 40  ;;  %s2342_s17 = sand.u32 (!%p2211_p8), 1, %s2085_s22  }
  0x64   : > { %s1584_s10 = sshll.u32 (!%p2211_p8), %s2342_s17, 3  ;;  %s278_s20 = scalar_lea.sflag (!%p2211_p8), [#allocation5], %s2342_s17 }
  0x65   : > { %s2348_s27 = scalar_lea.vmem (!%p2211_p8), [#allocation4], %s1584_s10  ;;  %p2571_p7 = scmp.ne.s32.totalorder (!%p2211_p8), %s2564_s7, 0 }
  0x6a   : > { %2064 = dma.done.wait (%p2571_p7), %s278_s20, 128  }
  0x6b   : > { %2066 = vsyncadd (%p2571_p7), %s278_s20, 4294967168  ;;  %p2572_p2 = scmp.ne.s32.totalorder %s2562_s29, 0 }
  0x6d   : > { %2068 = dma.done.wait (%p2572_p2), [#allocation8], 1024  }
  0x6e   : > { %2070 = vsyncadd (%p2572_p2), [#allocation8], 4294966272  ;;  %v2108_v0 = vmov 0.0|0.0   ;;  %vm2109_vm0 = vmmov 0   ;;  %v2110_v1 = vmov 0.0   ;;  %v328_v2 = vld [vmem:[#allocation7] sm:$0xff] }
  0x6f   : > { %1735 = vmatprep.subr.bf16.mxu0 %v2108_v0  ;;  %1741 = vmatprep.subr.bf16.mxu1 %v2108_v0  ;;  %v329_v3 = vld [vmem:[#allocation7 + $0x8] sm:$0xff]  ;;  %v330_v4 = vld [vmem:[#allocation7 + $0x10] sm:$0xff]  ;;  %v331_v6 = vld [vmem:[#allocation7 + $0x18] sm:$0xff]  ;;  %s2111_s9 = smov 96   ;;  %s2112_s28 = smov 64   ;;  %vm357_vm1 = vcmask 261120  }
  0x70   : > { %1659 = vmatprep.mubr.msk.f32.mxu0 %vm2109_vm0, %v2110_v1  ;;  %1670 = vmatprep.mubr.msk.f32.mxu1 %vm2109_vm0, %v2110_v1  ;;  %v1871_v5 = vpack.i.bf16 %v329_v3, %v328_v2  ;;  %v2367_v7 = vld [vmem:[%s2552_s2] ss:$0 sm:$0xff]  ;;  %v1748_v8 = vpack.c.bf16 %v329_v3, %v328_v2  ;;  %v1866_v9 = vpack.i.bf16 %v331_v6, %v330_v4  ;;  %v327_v19 = vld [vmem:[%s2348_s27] sm:$0xff]  ;;  %s2113_s11 = smov 120   ;;  %vm548_vm2 = vcmask 64512   ;;  %s2114_s8 = smov 112  }
  0x71   : > { %354 = vrot.lane.b32.xlu1 %v2367_v7, %s2111_s9  ;;  %v1751_v10 = vpack.c.bf16 %v331_v6, %v330_v4  ;;  %s2115_s15 = smov 104   ;;  %s1588_s19 = sshll.u32 %s2342_s17, 5  ;;  %vm1315_vm3 = vcmask 130048   ;;  %vm1317_vm4 = vcmask 195584  }
  0x72   : > { %1862 = vrot.lane.b32.xlu0 %v1871_v5, %s2111_s9  ;;  %s2412_s30 = scalar_lea.vmem [#allocation11], %s1588_s19  ;;  %s2116_s18 = smov 8  }
  0x73   : > { %s2117_s14 = smov 16   ;;  %s2118_s20 = smov 24  }
  0x74   : > { %s1614_s27 = sshll.u32 %s2093_s24, 9  ;;  %s1438_s29 = sshll.u32 %s2412_s30, 4  ;;  %s2464_s29 = int_to_ptr.vmem [resolvable:$true] %s1438_s29 }
  0x75   : > { %1872 = vrot.lane.b32.xlu1 %v1871_v5, %s2112_s28  ;;  %p2573_p12 = scmp.ne.s32.totalorder %s2569_s12, 0 }
  0x76   : > { %1867 = vrot.lane.b32.xlu0 %v1866_v9, %s2111_s9 }
  0x7a   : > { %1877 = vrot.lane.b32.xlu0 %v1866_v9, %s2112_s28 }
  0xe3   : > { %v355_v20 = vpop.permute.xlu1 %354 }
  0xe4   : > { %v1863_v11 = vpop.permute.xlu0 %1862 }
  0xe5   : > { %v1865_v12 = vunpack.i.h.bf16 %v1863_v11  ;;  %v1864_v13 = vunpack.i.l.bf16 %v1863_v11 }
  0xe7   : > { %v1736_v14 = vpack.c.bf16 %v1865_v12, %v1864_v13  ;;  %v1873_v21 = vpop.permute.xlu1 %1872 }
  0xe8   : > { %v1868_v15 = vpop.permute.xlu0 %1867  ;;  %v1875_v23 = vunpack.i.h.bf16 %v1873_v21  ;;  %v1874_v24 = vunpack.i.l.bf16 %v1873_v21 }
  0xe9   : > { %v1870_v16 = vunpack.i.h.bf16 %v1868_v15  ;;  %v1869_v17 = vunpack.i.l.bf16 %v1868_v15  ;;  %1737 = vmatpush3.bf16.msra.mxu0 %v1736_v14 }
  0xea   : > { %1738 = vmatprep.subr.bf16.mxu0 %v2108_v0  ;;  %v1742_v27 = vpack.c.bf16 %v1875_v23, %v1874_v24 }
  0xeb   : > { %v1739_v18 = vpack.c.bf16 %v1870_v16, %v1869_v17 }
  0xec   : > { %v1878_v22 = vpop.permute.xlu0 %1877  ;;  %1743 = vmatpush3.bf16.msra.mxu1 %v1742_v27 }
  0xed   : > { %1740 = vmatpush3.bf16.msra.mxu0 %v1739_v18  ;;  %v1880_v25 = vunpack.i.h.bf16 %v1878_v22  ;;  %v1879_v26 = vunpack.i.l.bf16 %v1878_v22  ;;  %1744 = vmatprep.subr.bf16.mxu1 %v2108_v0 }
  0xee   : > { %1747 = vmatprep.subr.bf16.mxu0 %v2108_v0 }
  0xef   : > { %v1745_v28 = vpack.c.bf16 %v1880_v25, %v1879_v26 }
  0xf0   : > { %1660 = vmatmul.mubr.msk.f32.vlgmr.msra.gmra.mrb[0].mxu0 %vm357_vm1, %v327_v19 }
  0xf1   : > { %1749 = vmatpush3.bf16.msra.mxu0 %v1748_v8  ;;  %1681 = vmatprep.mubr.msk.f32.mxu0 %vm2109_vm0, %v2110_v1 }
  0xf2   : > { %1750 = vmatprep.subr.bf16.mxu0 %v2108_v0  ;;  %1746 = vmatpush3.bf16.msra.mxu1 %v1745_v28 }
  0xf3   : > { %1684 = vmatprep.subr.mxu1 %v2110_v1 }
  0xf5   : > { %1752 = vmatpush3.bf16.msra.mxu0 %v1751_v10  ;;  %1671 = vmatmul.mubr.msk.f32.vlgmr.msra.gmra.mrb[0].mxu1 %vm357_vm1, %v327_v19 }
  0xf6   : > { %1704 = vmatprep.subr.mxu0 %v2110_v1  ;;  %1686 = vmatprep.mubr.msk.f32.mxu1 %vm2109_vm0, %v2110_v1 }
  0xf8   : > { %1682 = vmatmul.mubr.msk.f32.vlgmr.msra.gmra.mrb[2].mxu0 %vm357_vm1, %v327_v19 }
  0xf9   : > { %1706 = vmatprep.mubr.msk.f32.mxu0 %vm2109_vm0, %v2110_v1 }
 0x1c3   : > { %v427_v29 = vpop.f32.mrb[0].mxu0 }
 0x1c4   : > { %v428_v30 = vadd.f32 %v427_v29, %v355_v20  ;;  %v1661_v31 = vpop.f32.mrb[1].mxu0 }
 0x1c6   : > { %516 = vxpose.xlu1.b32.start.end [1/1] (short) (narrow) %v428_v30, 32 }
 0x1c8   : > { %v512_v36 = vpop.f32.mrb[0].mxu1 }
 0x1c9   : > { %v1672_v37 = vpop.f32.mrb[1].mxu1 }
 0x1cb   : > { %v638_v32 = vpop.f32.mrb[2].mxu0 }
 0x1cc   : > { %v1683_v33 = vpop.f32.mrb[3].mxu0  ;;  %v639_v34 = vadd.f32 %v2367_v7, %v638_v32 }
 0x1ce   : > { %v642_v35 = vmul.f32 0.35355338, %v639_v34 }
 0x1f0   : > { %806 = vrot.lane.b32.xlu1 %v642_v35, %s2113_s11 }
 0x246   : > { %v532_v38 = vpop.trf.xlu1 }
 0x247   : > { %549 = vst.msk [vmem:[#allocation2] sm:$0xff] %vm548_vm2, %v532_v38 }
 0x24a   : > { %v533_v39 = vpop.trf.xlu1 }
 0x24b   : > { %550 = vst.msk [vmem:[#allocation2 + $0x8] sm:$0xff] %vm548_vm2, %v533_v39  ;;  %v1319_v39 = vld [vmem:[#allocation9] sm:$0xff] }
 0x24e   : > { %v643_v40 = vld [vmem:[#allocation2] sm:$0xff]  ;;  %v534_v41 = vpop.trf.xlu1 }
 0x24f   : > { %1685 = vmatpush3.msra.mxu1 %v643_v40  ;;  %551 = vst.msk [vmem:[#allocation2 + $0x10] sm:$0xff] %vm548_vm2, %v534_v41  ;;  %v1320_v40 = vld [vmem:[#allocation9 + $0x8] sm:$0xff] }
 0x250   : > { %1687 = vmatmul.mubr.msk.f32.vlgmr.msra.gmra.mrb[2].mxu1 %vm548_vm2, %v642_v35  ;;  %1689 = vmatprep.subr.mxu1 %v2110_v1  ;;  %v1754_v41 = vpack.c.bf16 %v1320_v40, %v1319_v39 }
 0x251   : > { %1691 = vmatprep.mubr.msk.f32.mxu1 %vm2109_vm0, %v2110_v1 }
 0x252   : > { %v535_v42 = vpop.trf.xlu1  ;;  %v804_v61 = vld [vmem:[#allocation2 + $0x8] sm:$0xff] }
 0x253   : > { %552 = vst.msk [vmem:[#allocation2 + $0x18] sm:$0xff] %vm548_vm2, %v535_v42  ;;  %v1321_v42 = vld [vmem:[#allocation9 + $0x10] sm:$0xff] }
 0x256   : > { %v970_v51 = vld [vmem:[#allocation2 + $0x10] sm:$0xff] }
 0x257   : > { %1705 = vmatpush3.msra.mxu0 %v970_v51 }
 0x258   : > { %1714 = vmatprep.subr.mxu0 %v2110_v1 }
 0x25a   : > { %v1136_v55 = vld [vmem:[#allocation2 + $0x18] sm:$0xff] }
 0x262   : > { %v807_v62 = vpop.permute.xlu1 %806 }
 0x323   : > { %v715_v43 = vpop.f32.mrb[2].mxu1 }
 0x324   : > { %v1688_v44 = vpop.f32.mrb[3].mxu1  ;;  %v719_v45 = vsel %vm548_vm2, %v715_v43, -inf }
 0x325   : > { %720 = vmax.xlane.f32.xlu0 %v719_v45 }
 0x3b2   : > { %v721_v46 = vpop.xlane.xlu0 %720 }
 0x3b3   : > { %v722_v47 = vsub.f32 %v715_v43, %v721_v46  ;;  %v1322_v43 = vld [vmem:[#allocation9 + $0x18] sm:$0xff] }
 0x3b4   : > { %v1757_v44 = vpack.c.bf16 %v1322_v43, %v1321_v42 }
 0x3b5   : > { %v723_v48 = vmul.f32 1.442695, %v722_v47 }
 0x3b7   : > { %1881 = vpow2.f32 %v723_v48 }
 0x3c1   : > { %v1882_v49 = vpop.eup %1881 }
 0x3c2   : > { %v725_v50 = vsel %vm548_vm2, %v1882_v49, 0.0 }
 0x3c3   : > { %726 = vadd.xlane.f32.xlu0 %v725_v50 }
 0x3d9   : > { %443 = vrot.lane.b32.xlu0 %v2367_v7, %s2112_s28  ;;  %s2462_s28 = scalar_lea.hbm %s2556_s6, %s1614_s27 }
 0x3dd   : > { %972 = vrot.lane.b32.xlu0 %v642_v35, %s2114_s8 }
 0x3e1   : > { %1138 = vrot.lane.b32.xlu0 %v642_v35, %s2115_s15 }
 0x450   : > { %v727_v52 = vpop.xlane.xlu0 %726 }
 0x451   : > { %1883 = vrcp.f32 %v727_v52 }
 0x454   : > { %v444_v53 = vpop.permute.xlu0 %443 }
 0x455   : > { %v513_v54 = vadd.f32 %v512_v36, %v444_v53 }
 0x457   : > { %553 = vst.msk [vmem:[#allocation3] sm:$0xff] %vm357_vm1, %v513_v54 }
 0x458   : > { %v973_v56 = vpop.permute.xlu0 %972 }
 0x459   : > { %1707 = vmatmul.mubr.msk.f32.vlgmr.msra.gmra.mrb[4].mxu0 %vm548_vm2, %v973_v56 }
 0x45a   : > { %1715 = vmatpush3.msra.mxu0 %v1136_v55  ;;  %1716 = vmatprep.mubr.msk.f32.mxu0 %vm2109_vm0, %v2110_v1 }
 0x45b   : > { %v1884_v57 = vpop.eup %1883  ;;  %1753 = vmatprep.subr.bf16.mxu0 %v2108_v0 }
 0x45c   : > { %v729_v58 = vmul.f32 %v1884_v57, %v1882_v49  ;;  %v1139_v59 = vpop.permute.xlu0 %1138 }
 0x45d   : > { %1717 = vmatmul.mubr.msk.f32.vlgmr.msra.gmra.mrb[6].mxu0 %vm548_vm2, %v1139_v59 }
 0x45e   : > { %730 = vst.msk [vmem:[%s2412_s30] sm:$0xff] %vm548_vm2, %v729_v58  ;;  %v644_v60 = vld [vmem:[#allocation3] sm:$0xff]  ;;  %1732 = vmatprep.mubr.msk.f32.mxu0 %vm2109_vm0, %v2110_v1  ;;  %1755 = vmatpush3.bf16.msra.mxu0 %v1754_v41 }
 0x45f   : > { %1690 = vmatpush3.msra.mxu1 %v644_v60  ;;  %1756 = vmatprep.subr.bf16.mxu0 %v2108_v0 }
 0x460   : > { %1692 = vmatmul.mubr.msk.f32.vlgmr.msra.gmra.mrb[4].mxu1 %vm548_vm2, %v729_v58  ;;  %1694 = vmatprep.subr.mxu1 %v2110_v1 }
 0x461   : > { %1695 = vmatpush3.msra.mxu1 %v804_v61  ;;  %1696 = vmatprep.mubr.msk.f32.mxu1 %vm2109_vm0, %v2110_v1 }
 0x462   : > { %1699 = vmatprep.subr.mxu1 %v2110_v1  ;;  %1758 = vmatpush3.bf16.msra.mxu0 %v1757_v44 }
 0x464   : > { %1697 = vmatmul.mubr.msk.f32.vlgmr.msra.gmra.mrb[6].mxu1 %vm548_vm2, %v807_v62 }
 0x465   : > { %1701 = vmatprep.mubr.msk.f32.mxu1 %vm2109_vm0, %v2110_v1 }
 0x52c   : > { %v1042_v63 = vpop.f32.mrb[4].mxu0 }
 0x52d   : > { %v1708_v2 = vpop.f32.mrb[5].mxu0  ;;  %v1046_v3 = vsel %vm548_vm2, %v1042_v63, -inf }
 0x52e   : > { %1047 = vmax.xlane.f32.xlu1 %v1046_v3 }
 0x530   : > { %v1208_v4 = vpop.f32.mrb[6].mxu0 }
 0x531   : > { %v1718_v5 = vpop.f32.mrb[7].mxu0  ;;  %v1212_v11 = vsel %vm548_vm2, %v1208_v4, -inf }
 0x533   : > { %v2427_v6 = vpop.f32.mrb[4].mxu1 }
 0x534   : > { %v1693_v7 = vpop.f32.mrb[5].mxu1 }
 0x537   : > { %v876_v8 = vpop.f32.mrb[6].mxu1 }
 0x538   : > { %v1698_v9 = vpop.f32.mrb[7].mxu1  ;;  %v880_v10 = vsel %vm548_vm2, %v876_v8, -inf }
 0x539   : > { %881 = vmax.xlane.f32.xlu0 %v880_v10 }
 0x53d   : > { %1213 = vmax.xlane.f32.xlu0 %v1212_v11 }
 0x53f   : > { %1060 = vrot.lane.b32.xlu1 %v644_v60, %s2114_s8  ;;  %s1983_s8 = scalar_lea.vmem %s2464_s29, 512 }
 0x540   : > { %p1984_p8 = scmp.ne.s32.totalorder %s2464_s29, %s1983_s8 }
 0x542   : > { %p1985_p1 = pnand %p1984_p8, %p2573_p12 }
 0x543   : > { %1226 = vrot.lane.b32.xlu1 %v644_v60, %s2115_s15  ;;  %s2119_s15 = smov [#allocation11]  }
 0x544   : > { %p1986_p10 = pneg %p1985_p1  ;;  %s1987_s19 = sshll.u32 %s2119_s15, 4  ;;  %s1988_s19 = int_to_ptr.vmem [resolvable:$false] %s1987_s19 }
 0x545   : > { %p1990_p3 = scmp.lt.s32.totalorder %s2464_s29, %s1988_s19 }
 0x5bb   : > { %v1048_v12 = vpop.xlane.xlu1 %1047 }
 0x5bc   : > { %v1049_v13 = vsub.f32 %v1042_v63, %v1048_v12 }
 0x5be   : > { %v1050_v14 = vmul.f32 1.442695, %v1049_v13 }
 0x5bf   : > { %v1061_v36 = vpop.permute.xlu1 %1060 }
 0x5c0   : > { %1885 = vpow2.f32 %v1050_v14 }
 0x5c3   : > { %v1227_v38 = vpop.permute.xlu1 %1226 }
 0x5c6   : > { %v882_v15 = vpop.xlane.xlu0 %881 }
 0x5c7   : > { %v883_v16 = vsub.f32 %v876_v8, %v882_v15 }
 0x5c9   : > { %v884_v21 = vmul.f32 1.442695, %v883_v16 }
 0x5ca   : > { %v1886_v17 = vpop.eup %1885  ;;  %v1214_v18 = vpop.xlane.xlu0 %1213 }
 0x5cb   : > { %v1215_v19 = vsub.f32 %v1208_v4, %v1214_v18  ;;  %v1052_v20 = vsel %vm548_vm2, %v1886_v17, 0.0 }
 0x5cc   : > { %1053 = vadd.xlane.f32.xlu0 %v1052_v20 }
 0x5cd   : > { %v1216_v22 = vmul.f32 1.442695, %v1215_v19 }
 0x5cf   : > { %1887 = vpow2.f32 %v1216_v22 }
 0x5d0   : > { %1889 = vpow2.f32 %v884_v21 }
 0x5d9   : > { %v1888_v23 = vpop.eup %1887 }
 0x5da   : > { %v1218_v24 = vsel %vm548_vm2, %v1888_v23, 0.0  ;;  %v1890_v25 = vpop.eup %1889 }
 0x5db   : > { %1219 = vadd.xlane.f32.xlu0 %v1218_v24  ;;  %v886_v26 = vsel %vm548_vm2, %v1890_v25, 0.0 }
 0x5df   : > { %887 = vadd.xlane.f32.xlu0 %v886_v26 }
 0x5f5   : > { %894 = vrot.lane.b32.xlu0 %v644_v60, %s2113_s11  ;;  %s1410_s11 = scalar_lea.sflag [#allocation12], %s2342_s17 }
 0x659   : > { %v1054_v27 = vpop.xlane.xlu0 %1053 }
 0x65a   : > { %1891 = vrcp.f32 %v1054_v27 }
 0x664   : > { %v1892_v28 = vpop.eup %1891 }
 0x665   : > { %v1056_v29 = vmul.f32 %v1892_v28, %v1886_v17 }
 0x667   : > { %1600 = vst.msk [vmem:[%s2412_s30 + $0x10] sm:$0xff] %vm548_vm2, %v1056_v29 }
 0x668   : > { %v1220_v30 = vpop.xlane.xlu0 %1219 }
 0x669   : > { %1893 = vrcp.f32 %v1220_v30 }
 0x66c   : > { %v888_v31 = vpop.xlane.xlu0 %887 }
 0x66d   : > { %1895 = vrcp.f32 %v888_v31 }
 0x670   : > { %v895_v32 = vpop.permute.xlu0 %894 }
 0x671   : > { %1700 = vmatpush3.msra.mxu1 %v895_v32 }
 0x672   : > { %1709 = vmatprep.subr.mxu1 %v2110_v1 }
 0x673   : > { %v1894_v33 = vpop.eup %1893 }
 0x674   : > { %v1222_v34 = vmul.f32 %v1894_v33, %v1888_v23 }
 0x676   : > { %1603 = vst.msk [vmem:[%s2412_s30 + $0x18] sm:$0xff] %vm548_vm2, %v1222_v34 }
 0x677   : > { %v1896_v35 = vpop.eup %1895 }
 0x678   : > { %v890_v37 = vmul.f32 %v1896_v35, %v1890_v25 }
 0x67a   : > { %1597 = vst.msk [vmem:[%s2412_s30 + $0x8] sm:$0xff] %vm548_vm2, %v890_v37  ;;  %1702 = vmatmul.mubr.msk.f32.vlgmr.msra.gmra.mrb[8].mxu1 %vm548_vm2, %v890_v37  ;;  %s1989_s30 = scalar_lea.vmem %s1988_s19, 1024 }
 0x67b   : > { %1710 = vmatpush3.msra.mxu1 %v1061_v36  ;;  %1711 = vmatprep.mubr.msk.f32.mxu1 %vm2109_vm0, %v2110_v1  ;;  %p1991_p5 = scmp.lt.s32.totalorder %s1989_s30, %s1983_s8 }
 0x67c   : > { %1719 = vmatprep.subr.mxu1 %v2110_v1 }
 0x67d   : > { %p1992_p9 = por %p1991_p5, %p1990_p3 }
 0x67e   : > { %1712 = vmatmul.mubr.msk.f32.vlgmr.msra.gmra.mrb[10].mxu1 %vm548_vm2, %v1056_v29 }
 0x67f   : > { %1720 = vmatpush3.msra.mxu1 %v1227_v38  ;;  %1721 = vmatprep.mubr.msk.f32.mxu1 %vm2109_vm0, %v2110_v1  ;;  %p1993_p11 = pnand %p1992_p9, %p1986_p10 }
 0x682   : > { %1722 = vmatmul.mubr.msk.f32.vlgmr.msra.gmra.mrb[12].mxu1 %vm548_vm2, %v1222_v34 }
 0x74d   : > { %v966_v45 = vpop.f32.mrb[8].mxu1 }
 0x74e   : > { %1303 = vrot.lane.b32.xlu0 %v966_v45, %s2116_s18  ;;  %v1703_v46 = vpop.f32.mrb[9].mxu1 }
 0x751   : > { %v1132_v47 = vpop.f32.mrb[10].mxu1 }
 0x752   : > { %1307 = vrot.lane.b32.xlu1 %v1132_v47, %s2117_s14  ;;  %v1713_v1 = vpop.f32.mrb[11].mxu1 }
 0x755   : > { %v1298_v48 = vpop.f32.mrb[12].mxu1 }
 0x756   : > { %1311 = vrot.lane.b32.xlu0 %v1298_v48, %s2118_s20  ;;  %v1723_v0 = vpop.f32.mrb[13].mxu1 }
 0x7c0   : > { %v1304_v49 = vpop.permute.xlu0 %1303 }
 0x7c1   : > { %v1314_v51 = vsel %vm548_vm2, %v2427_v6, %v1304_v49 }
 0x7c4   : > { %v1308_v50 = vpop.permute.xlu1 %1307 }
 0x7c5   : > { %v1316_v52 = vsel %vm1315_vm3, %v1314_v51, %v1308_v50 }
 0x7c8   : > { %v1312_v53 = vpop.permute.xlu0 %1311 }
 0x7c9   : > { %v1318_v54 = vsel %vm1317_vm4, %v1316_v52, %v1312_v53 }
 0x7ca   : > { %1733 = vmatmul.mubr.msk.f32.vlgmr.msra.gmra.mrb[8].mxu0 %vm357_vm1, %v1318_v54 }
 0x7cb   : > { %1996 = shalt.err (!%p1993_p11)
}
 0x7cc   : > { %s1997_s14 = scalar_lea.hbm %s2462_s28, 512  ;;  %s2001_s7 = scalar_lea.hbm %s2556_s6, 1024 }
 0x7cd   : > { %p1998_p0 = scmp.ne.s32.totalorder %s2462_s28, %s1997_s14  ;;  %p2002_p6 = scmp.lt.u32.totalorder %s2462_s28, %s2556_s6 }
 0x7ce   : > { %p2003_p7 = scmp.lt.u32.totalorder %s2001_s7, %s1997_s14  ;;  %p2005_p8 = scmp.lt.u32.totalorder %s1997_s14, %s2462_s28 }
 0x7cf   : > { %p1999_p4 = pnand %p1998_p0, %p2573_p12 }
 0x7d0   : > { %p2004_p2 = por %p2003_p7, %p2002_p6 }
 0x7d1   : > { %p2000_p13 = pneg %p1999_p4 }
 0x7d2   : > { %p2006_p1 = por %p2005_p8, %p2004_p2 }
 0x7d4   : > { %p2007_p10 = pnand %p2006_p1, %p2000_p13 }
 0x7d6   : > { %2010 = shalt.err (!%p2007_p10)
}
 0x7d7   : > { %s2120_s8 = smov 128   ;;  %v1605_v55 = vld [vmem:[%s2554_s4] ss:$0 sm:$0xff]  ;;  %s1609_s14 = sshll.u32 %s2093_s24, 7 }
 0x7d8   : > { %1770 = dma.vmem_to_hbm [thread:$0]  (%p2573_p12), %s2464_s29, 512, %s2462_s28, %s1410_s11, %s2120_s8, %s2120_s8, %s2116_s18  }
 0x7d9   : > { %s315_s20 = scalar_lea.vmem [#allocation10], %s1584_s10  ;;  %s2500_s15 = scalar_lea.hbm %s2555_s5, %s1609_s14 }
 0x7da   : > { %s1424_s27 = sshll.u32 %s315_s20, 4  ;;  %s1405_s18 = scalar_lea.sflag [#allocation6], %s2342_s17  ;;  %s2502_s27 = int_to_ptr.vmem [resolvable:$true] %s1424_s27 }
 0x7db   : > { %s2011_s24 = scalar_lea.vmem %s2502_s27, 128  ;;  %s2121_s10 = smov [#allocation10]  }
 0x7dc   : > { %p2012_p3 = scmp.ne.s32.totalorder %s2502_s27, %s2011_s24  ;;  %s2015_s29 = sshll.u32 %s2121_s10, 4  ;;  %s2016_s29 = int_to_ptr.vmem [resolvable:$false] %s2015_s29 }
 0x7dd   : > { %s2017_s28 = scalar_lea.vmem %s2016_s29, 256  ;;  %p2018_p11 = scmp.lt.s32.totalorder %s2502_s27, %s2016_s29 }
 0x7de   : > { %p2013_p5 = pnand %p2012_p3, %p2573_p12  ;;  %p2019_p0 = scmp.lt.s32.totalorder %s2017_s28, %s2011_s24 }
 0x7e0   : > { %p2014_p9 = pneg %p2013_p5  ;;  %p2020_p4 = por %p2019_p0, %p2018_p11 }
 0x7e2   : > { %p2021_p13 = pnand %p2020_p4, %p2014_p9 }
 0x89d   : > { %v1399_v56 = vpop.f32.mrb[8].mxu0 }
 0x89e   : > { %v1400_v57 = vadd.f32 %v1605_v55, %v1399_v56  ;;  %v1734_v58 = vpop.f32.mrb[9].mxu0 }
 0x8a0   : > { %1403 = vst.msk [vmem:[%s315_s20] sm:$0xff] %vm357_vm1, %v1400_v57 }
 0x8a1   : > { %2024 = shalt.err (!%p2021_p13)
}
 0x8a2   : > { %s2025_s17 = scalar_lea.hbm %s2500_s15, 128  ;;  %s2029_s19 = scalar_lea.hbm %s2555_s5, 256 }
 0x8a3   : > { %p2026_p6 = scmp.ne.s32.totalorder %s2500_s15, %s2025_s17  ;;  %p2030_p8 = scmp.lt.u32.totalorder %s2500_s15, %s2555_s5 }
 0x8a4   : > { %p2031_p1 = scmp.lt.u32.totalorder %s2029_s19, %s2025_s17  ;;  %p2033_p3 = scmp.lt.u32.totalorder %s2025_s17, %s2500_s15 }
 0x8a5   : > { %p2027_p7 = pnand %p2026_p6, %p2573_p12 }
 0x8a6   : > { %p2032_p10 = por %p2031_p1, %p2030_p8 }
 0x8a7   : > { %p2028_p2 = pneg %p2027_p7 }
 0x8a8   : > { %p2034_p5 = por %p2033_p3, %p2032_p10 }
 0x8aa   : > { %p2035_p9 = pnand %p2034_p5, %p2028_p2 }
 0x8ac   : > { %2038 = shalt.err (!%p2035_p9)
}
 0x8ad   : > { %1769 = dma.vmem_to_hbm [thread:$0]  (%p2573_p12), %s2502_s27, 128, %s2500_s15, %s1405_s18  }
 0x8ae PF: > { %s2574_s20 = sld [smem:[#allocation17_spill]]  ;;  %s1453_s7 = sand.u32 1, %s2081_s21  }
 0x8af   : > { %p2576_p0 = scmp.ge.s32.totalorder %s2101_s26, 2  ;;  %s1454_s9 = scalar_lea.sflag [#allocation6], %s1453_s7 }
 0x8b4   : > { %p2575_p11 = scmp.ne.s32.totalorder %s2574_s20, 0 }
 0x8b6   : > { %p1785_p4 = pnand %p2576_p0, %p2575_p11 }
 0x8b8   : > { %2072 = dma.done.wait (!%p1785_p4), %s1454_s9, 128  }
 0x8b9   : > { %2074 = vsyncadd (!%p1785_p4), %s1454_s9, 4294967168  ;;  %s1463_s24 = scalar_lea.sflag [#allocation12], %s1453_s7 }
 0x8ba   : > { %2076 = dma.done.wait (!%p1785_p4), %s1463_s24, 512  }
 0x8bb   : > { %2078 = vsyncadd (!%p1785_p4), %s1463_s24, 4294966784  ;;  %s27_s26 = sadd.s32 1, %s2101_s26   ;;  %s2577_s21 = smov %s2085_s22 }
 0x8bc   : > { %p24_p13 = scmp.ge.s32.totalorder %s27_s26, 4   ;;  %s2578_s22 = smov %s2089_s23 }
 0x8bd   : > { %s2579_s23 = smov %s2299_s13  ;;  %s2580_s24 = smov %s2097_s25 }
 0x8be   : > { %s2581_s25 = smov %s2583_s16  ;;  %26 = sbr.rel (!%p24_p13) target bundleno = 9 (0x9), region = 118 }
 0x8c5   :  { %1468 = vsyncpa [#allocation5], 1 }
 0x8c6   :  { %1470 = vsyncpa [#allocation5 + $0x1], 1 }
 0x8c7   :  { %1471 = vsyncpa [#allocation8], 1 }
 0x8c8   :  { %1472 = vsyncpa [#allocation6], 1 }
 0x8c9   :  { %1474 = vsyncpa [#allocation6 + $0x1], 1 }
 0x8ca   :  { %1475 = vsyncpa [#allocation12], 1 }
 0x8cb   :  { %1477 = vsyncpa [#allocation12 + $0x1], 1 }

</bundles_post_ra>
